<compile_context>
chip_gen: v5e
topology: v5e:2x2
jax: 0.10.0
libtpu: 0.0.40
codegen_flags: <defaults>
</compile_context>

<pallas_src>
import jax
import jax.numpy as jnp
from jax.experimental import pallas as pl
from jax.experimental.pallas import tpu as pltpu


def _fft_mlp_kernel(xr_ref, xi_ref, w1r_ref, w1i_ref, w2r_ref, w2i_ref,
                    or_ref, oi_ref):
    # xr_ref/xi_ref : (Cin, TM)   channels on sublanes, freq pixels lane-dense
    # w1r/w1i       : (2*Cout, Cin)   column halves of conv1 weight
    # w2r/w2i       : (Cout, 2*Cout)  row halves of conv2 weight
    # or_ref/oi_ref : (Cout, TM)
    h = jnp.dot(w1r_ref[...], xr_ref[...], preferred_element_type=jnp.float32)
    h = h + jnp.dot(w1i_ref[...], xi_ref[...],
                    preferred_element_type=jnp.float32)
    h = jnp.maximum(h, 0.0)                                  # ReLU
    or_ref[...] = jnp.dot(w2r_ref[...], h,
                          preferred_element_type=jnp.float32).astype(or_ref.dtype)
    oi_ref[...] = jnp.dot(w2i_ref[...], h,
                          preferred_element_type=jnp.float32).astype(oi_ref.dtype)


def _round_up(x, m):
    return ((x + m - 1) // m) * m


def _choose_tm(L, cin, cout, *, max_tm=65536, vmem_budget_bytes=24 << 20):
    """Pick a lane-tile width (multiple of 128, or full extent for tiny L)."""
    if L <= 256:
        return L, 1                      # single full-extent block
    itemsize = 4                         # f32 activations
    # 2 input slabs (cin rows) + 2 output slabs (cout rows), double-buffered,
    # plus ~75% headroom for the kernel's VMEM temporaries (h, dot results).
    per_lane = int(3.5 * (2 * cin + 2 * cout) * itemsize)
    tm = max(128, (vmem_budget_bytes // per_lane) // 128 * 128)
    tm = min(tm, max_tm)
    # Keep >= 2 grid blocks so both v7x TensorCores have work.
    tm = min(tm, _round_up(pl.cdiv(L, 2), 128))
    return tm, pl.cdiv(L, tm)


def fft_conv_mlp(xr, xi, w1r, w1i, w2r, w2i, *, max_tm=65536):
    """Per frequency pixel: or,oi = split(w2 @ relu(w1 @ [xr; xi])).

    xr, xi : (B, Cin, L)  real / imag slabs, freq pixels lane-dense
    w1r,w1i: (2*Cout, Cin)
    w2r,w2i: (Cout, 2*Cout)
    returns (o_real, o_imag), each (B, Cout, L)
    """
    B, cin, L = xr.shape
    assert xi.shape == xr.shape
    h2, cin_w = w1r.shape
    cout, hk = w2r.shape
    assert w1i.shape == w1r.shape and w2i.shape == w2r.shape
    assert cin_w == cin
    # PyTorch module declares conv2 as Conv2d(in*2, out*2); it only composes
    # when in_channel == out_channel.  We inherit that constraint.
    assert hk == h2, "ResBlock_G requires in_channel == out_channel"

    tm, grid_m = _choose_tm(L, cin, cout, max_tm=max_tm)

    flops = int(2 * B * L * (2 * h2 * cin + 2 * cout * h2))
    bytes_accessed = int(4 * (2 * xr.size + 2 * B * cout * L
                              + 2 * w1r.size + 2 * w2r.size))

    return pl.pallas_call(
        _fft_mlp_kernel,
        out_shape=(jax.ShapeDtypeStruct((B, cout, L), xr.dtype),
                   jax.ShapeDtypeStruct((B, cout, L), xr.dtype)),
        grid_spec=pltpu.PrefetchScalarGridSpec(
            num_scalar_prefetch=0,
            grid=(B, grid_m),
            in_specs=[
                # batch dim squeezed; channels on sublanes, pixels on lanes
                pl.BlockSpec((None, cin, tm), lambda b, m: (b, 0, m)),
                pl.BlockSpec((None, cin, tm), lambda b, m: (b, 0, m)),
                pl.BlockSpec((h2, cin), lambda b, m: (0, 0)),
                pl.BlockSpec((h2, cin), lambda b, m: (0, 0)),
                pl.BlockSpec((cout, h2), lambda b, m: (0, 0)),
                pl.BlockSpec((cout, h2), lambda b, m: (0, 0)),
            ],
            out_specs=(
                pl.BlockSpec((None, cout, tm), lambda b, m: (b, 0, m)),
                pl.BlockSpec((None, cout, tm), lambda b, m: (b, 0, m)),
            ),
        ),
        compiler_params=pltpu.CompilerParams(
            dimension_semantics=("parallel", "parallel"),
            vmem_limit_bytes=32 << 20),
        cost_estimate=pl.CostEstimate(
            flops=flops, transcendentals=0, bytes_accessed=bytes_accessed),
    )(xr, xi, w1r, w1i, w2r, w2i)


def res_block_g_forward(x, w_conv1, w_conv2, norm="backward",
                        fold_threshold=1 << 15):
    """Matches ResBlock_G.forward.

    x       : (N, C, H, W) float32 (NCHW, like PyTorch)
    w_conv1 : (2*Cout, 2*Cin, 1, 1) float32
    w_conv2 : (2*Cout, 2*Cin, 1, 1) float32
    returns : (N, Cout, H, W) float32
    """
    N, C, H, W = x.shape
    # rfft2 over the last two dims (PyTorch default 'backward' normalization).
    y = jnp.fft.rfft2(x, norm=norm)                      # (N, C, H, Wf) complex
    Wf = y.shape[-1]
    M = H * Wf

    cout2 = w_conv1.shape[0]
    cout = cout2 // 2

    # Conv2d 1x1 weights (out, in, 1, 1) -> (out, in), split for the kernel.
    w1 = w_conv1[:, :, 0, 0]
    w2 = w_conv2[:, :, 0, 0]
    w1r, w1i = w1[:, :C], w1[:, C:]                      # (2*Cout, C) each
    w2r, w2i = w2[:cout, :], w2[cout:, :]                # (Cout, 2*Cout) each

    # Small per-batch frequency extent -> fold batch into the lane axis so
    # tiles stay wide; the transpose fuses into the real/imag-extraction copy.
    fold = (N > 1) and (M < fold_threshold)
    if fold:
        xr = jnp.transpose(y.real, (1, 0, 2, 3)).reshape(1, C, N * M)
        xi = jnp.transpose(y.imag, (1, 0, 2, 3)).reshape(1, C, N * M)
    else:
        xr = y.real.reshape(N, C, M)                     # free reshape
        xi = y.imag.reshape(N, C, M)

    o_r, o_i = fft_conv_mlp(xr, xi, w1r, w1i, w2r, w2i)

    if fold:
        o_r = o_r.reshape(cout, N, H, Wf)                # free reshape
        o_i = o_i.reshape(cout, N, H, Wf)
        y_c = jax.lax.complex(o_r, o_i)
        out = jnp.fft.irfft2(y_c, s=(H, W), norm=norm)   # (Cout, N, H, W)
        return jnp.transpose(out, (1, 0, 2, 3))
    else:
        o_r = o_r.reshape(N, cout, H, Wf)
        o_i = o_i.reshape(N, cout, H, Wf)
        y_c = jax.lax.complex(o_r, o_i)
        return jnp.fft.irfft2(y_c, s=(H, W), norm=norm)  # (N, Cout, H, W)


if __name__ == "__main__":
    key = jax.random.PRNGKey(0)
    k_x, k_w1, k_w2 = jax.random.split(key, 3)

    in_channel = 4
    out_channel = 4          # conv2 in the PyTorch module requires in == out
    N, H, W = 2, 16, 16

    x = jax.random.normal(k_x, (N, in_channel, H, W), dtype=jnp.float32)
    # Conv2d(in*2, out*2, kernel_size=1, bias=False) weights
    w_conv1 = 0.1 * jax.random.normal(
        k_w1, (out_channel * 2, in_channel * 2, 1, 1), dtype=jnp.float32)
    w_conv2 = 0.1 * jax.random.normal(
        k_w2, (out_channel * 2, in_channel * 2, 1, 1), dtype=jnp.float32)

    # Pure-JAX reference for correctness (same FFT glue, XLA einsum convs).
    def ref_forward(xx, wc1, wc2, norm="backward"):
        yf = jnp.fft.rfft2(xx, norm=norm)
        yc = jnp.concatenate([yf.real, yf.imag], axis=1)
        h = jnp.einsum("oc,nchw->nohw", wc1[:, :, 0, 0], yc)
        h = jnp.maximum(h, 0.0)
        o = jnp.einsum("oc,nchw->nohw", wc2[:, :, 0, 0], h)
        orr, oii = jnp.split(o, 2, axis=1)
        return jnp.fft.irfft2(jax.lax.complex(orr, oii),
                              s=xx.shape[-2:], norm=norm)

    y_ref = ref_forward(x, w_conv1, w_conv2)

    # Batch-folded path (small H*Wf here => batch folded into lane axis).
    y = res_block_g_forward(x, w_conv1, w_conv2, norm="backward")
    jax.block_until_ready(y)
    assert y.shape == (N, out_channel, H, W)
    assert y.dtype == jnp.float32
    max_err = float(jnp.max(jnp.abs(y - y_ref)))
    assert jnp.allclose(y, y_ref, atol=5e-3, rtol=5e-2), max_err

    # Per-batch (non-folded) layout as well, to keep both paths exercised.
    y2 = res_block_g_forward(x, w_conv1, w_conv2, norm="backward",
                             fold_threshold=0)
    jax.block_until_ready(y2)
    max_err2 = float(jnp.max(jnp.abs(y2 - y_ref)))
    assert jnp.allclose(y2, y_ref, atol=5e-3, rtol=5e-2), max_err2

    print("KERNEL_OK")
</pallas_src>

<mosaic_0001>
module attributes {stable_mosaic.version = 11 : i64} {
  func.func @_fft_mlp_kernel(%arg0: i32, %arg1: i32, %arg2: memref<1x4x256xf32, #tpu.memory_space<vmem>>, %arg3: memref<1x4x256xf32, #tpu.memory_space<vmem>>, %arg4: memref<8x4xf32, #tpu.memory_space<vmem>>, %arg5: memref<8x4xf32, #tpu.memory_space<vmem>>, %arg6: memref<4x8xf32, #tpu.memory_space<vmem>>, %arg7: memref<4x8xf32, #tpu.memory_space<vmem>>, %arg8: memref<1x4x256xf32, #tpu.memory_space<vmem>>, %arg9: memref<1x4x256xf32, #tpu.memory_space<vmem>>) attributes {dimension_semantics = [#tpu.dimension_semantics<parallel>, #tpu.dimension_semantics<parallel>], iteration_bounds = array<i64: 1, 2>, scalar_prefetch = 0 : i64, scratch_operands = 0 : i64, tpu.core_type = #tpu.core_type<tc>, window_params = [{transform_indices = @transform_0, window_bounds = array<i64: 1, 4, 256>}, {transform_indices = @transform_1, window_bounds = array<i64: 1, 4, 256>}, {pipeline_mode = #tpu.pipeline_mode<synchronous>, transform_indices = @transform_2, window_bounds = array<i64: 8, 4>}, {pipeline_mode = #tpu.pipeline_mode<synchronous>, transform_indices = @transform_3, window_bounds = array<i64: 8, 4>}, {pipeline_mode = #tpu.pipeline_mode<synchronous>, transform_indices = @transform_4, window_bounds = array<i64: 4, 8>}, {pipeline_mode = #tpu.pipeline_mode<synchronous>, transform_indices = @transform_5, window_bounds = array<i64: 4, 8>}, {transform_indices = @transform_6, window_bounds = array<i64: 1, 4, 256>}, {transform_indices = @transform_7, window_bounds = array<i64: 1, 4, 256>}]} {
    %c0 = arith.constant 0 : index
    %c0_0 = arith.constant 0 : index
    %0 = vector.load %arg4[%c0, %c0_0] : memref<8x4xf32, #tpu.memory_space<vmem>>, vector<8x4xf32>
    %c0_1 = arith.constant 0 : index
    %c0_2 = arith.constant 0 : index
    %c0_3 = arith.constant 0 : index
    %1 = vector.load %arg2[%c0_1, %c0_2, %c0_3] : memref<1x4x256xf32, #tpu.memory_space<vmem>>, vector<1x4x256xf32>
    %2 = vector.shape_cast %1 : vector<1x4x256xf32> to vector<4x256xf32>
    %cst = arith.constant dense<0.000000e+00> : vector<8x256xf32>
    %3 = tpu.matmul %0, %2, %cst {dimension_numbers = #tpu.dot_dimension_numbers<[1], [0], [0], [1], [0, 0, 1, 1], [], []>} : vector<8x4xf32>, vector<4x256xf32>, vector<8x256xf32> -> vector<8x256xf32>
    %c0_4 = arith.constant 0 : index
    %c0_5 = arith.constant 0 : index
    %4 = vector.load %arg5[%c0_4, %c0_5] : memref<8x4xf32, #tpu.memory_space<vmem>>, vector<8x4xf32>
    %c0_6 = arith.constant 0 : index
    %c0_7 = arith.constant 0 : index
    %c0_8 = arith.constant 0 : index
    %5 = vector.load %arg3[%c0_6, %c0_7, %c0_8] : memref<1x4x256xf32, #tpu.memory_space<vmem>>, vector<1x4x256xf32>
    %6 = vector.shape_cast %5 : vector<1x4x256xf32> to vector<4x256xf32>
    %cst_9 = arith.constant dense<0.000000e+00> : vector<8x256xf32>
    %7 = tpu.matmul %4, %6, %cst_9 {dimension_numbers = #tpu.dot_dimension_numbers<[1], [0], [0], [1], [0, 0, 1, 1], [], []>} : vector<8x4xf32>, vector<4x256xf32>, vector<8x256xf32> -> vector<8x256xf32>
    %8 = arith.addf %3, %7 : vector<8x256xf32>
    %cst_10 = arith.constant 0.000000e+00 : f32
    %9 = vector.broadcast %cst_10 : f32 to vector<8x256xf32>
    %10 = arith.maximumf %8, %9 : vector<8x256xf32>
    %c0_11 = arith.constant 0 : index
    %c0_12 = arith.constant 0 : index
    %11 = vector.load %arg6[%c0_11, %c0_12] : memref<4x8xf32, #tpu.memory_space<vmem>>, vector<4x8xf32>
    %cst_13 = arith.constant dense<0.000000e+00> : vector<4x256xf32>
    %12 = tpu.matmul %11, %10, %cst_13 {dimension_numbers = #tpu.dot_dimension_numbers<[1], [0], [0], [1], [0, 0, 1, 1], [], []>} : vector<4x8xf32>, vector<8x256xf32>, vector<4x256xf32> -> vector<4x256xf32>
    %c0_14 = arith.constant 0 : index
    %c0_15 = arith.constant 0 : index
    %c0_16 = arith.constant 0 : index
    %13 = vector.load %arg8[%c0_14, %c0_15, %c0_16] : memref<1x4x256xf32, #tpu.memory_space<vmem>>, vector<1x4x256xf32>
    %14 = vector.shape_cast %13 : vector<1x4x256xf32> to vector<4x256xf32>
    %15 = vector.shape_cast %12 : vector<4x256xf32> to vector<1x4x256xf32>
    tpu.vector_store %arg8[%c0_14, %c0_15, %c0_16], %15 {strides = array<i32>} : memref<1x4x256xf32, #tpu.memory_space<vmem>>, vector<1x4x256xf32>,
    %c0_17 = arith.constant 0 : index
    %c0_18 = arith.constant 0 : index
    %16 = vector.load %arg7[%c0_17, %c0_18] : memref<4x8xf32, #tpu.memory_space<vmem>>, vector<4x8xf32>
    %cst_19 = arith.constant dense<0.000000e+00> : vector<4x256xf32>
    %17 = tpu.matmul %16, %10, %cst_19 {dimension_numbers = #tpu.dot_dimension_numbers<[1], [0], [0], [1], [0, 0, 1, 1], [], []>} : vector<4x8xf32>, vector<8x256xf32>, vector<4x256xf32> -> vector<4x256xf32>
    %c0_20 = arith.constant 0 : index
    %c0_21 = arith.constant 0 : index
    %c0_22 = arith.constant 0 : index
    %18 = vector.load %arg9[%c0_20, %c0_21, %c0_22] : memref<1x4x256xf32, #tpu.memory_space<vmem>>, vector<1x4x256xf32>
    %19 = vector.shape_cast %18 : vector<1x4x256xf32> to vector<4x256xf32>
    %20 = vector.shape_cast %17 : vector<4x256xf32> to vector<1x4x256xf32>
    tpu.vector_store %arg9[%c0_20, %c0_21, %c0_22], %20 {strides = array<i32>} : memref<1x4x256xf32, #tpu.memory_space<vmem>>, vector<1x4x256xf32>,
    return
  }
  func.func @transform_0(%arg0: i32, %arg1: i32) -> (i32, i32, i32) {
    %c0_i32 = arith.constant 0 : i32
    %c0_i32_0 = arith.constant 0 : i32
    return %arg0, %c0_i32, %arg1 : i32, i32, i32
  }
  func.func @transform_1(%arg0: i32, %arg1: i32) -> (i32, i32, i32) {
    %c0_i32 = arith.constant 0 : i32
    %c0_i32_0 = arith.constant 0 : i32
    return %arg0, %c0_i32, %arg1 : i32, i32, i32
  }
  func.func @transform_2(%arg0: i32, %arg1: i32) -> (i32, i32) {
    %c0_i32 = arith.constant 0 : i32
    %c0_i32_0 = arith.constant 0 : i32
    %c0_i32_1 = arith.constant 0 : i32
    return %c0_i32, %c0_i32_0 : i32, i32
  }
  func.func @transform_3(%arg0: i32, %arg1: i32) -> (i32, i32) {
    %c0_i32 = arith.constant 0 : i32
    %c0_i32_0 = arith.constant 0 : i32
    %c0_i32_1 = arith.constant 0 : i32
    return %c0_i32, %c0_i32_0 : i32, i32
  }
  func.func @transform_4(%arg0: i32, %arg1: i32) -> (i32, i32) {
    %c0_i32 = arith.constant 0 : i32
    %c0_i32_0 = arith.constant 0 : i32
    %c0_i32_1 = arith.constant 0 : i32
    return %c0_i32, %c0_i32_0 : i32, i32
  }
  func.func @transform_5(%arg0: i32, %arg1: i32) -> (i32, i32) {
    %c0_i32 = arith.constant 0 : i32
    %c0_i32_0 = arith.constant 0 : i32
    %c0_i32_1 = arith.constant 0 : i32
    return %c0_i32, %c0_i32_0 : i32, i32
  }
  func.func @transform_6(%arg0: i32, %arg1: i32) -> (i32, i32, i32) {
    %c0_i32 = arith.constant 0 : i32
    %c0_i32_0 = arith.constant 0 : i32
    return %arg0, %c0_i32, %arg1 : i32, i32, i32
  }
  func.func @transform_7(%arg0: i32, %arg1: i32) -> (i32, i32, i32) {
    %c0_i32 = arith.constant 0 : i32
    %c0_i32_0 = arith.constant 0 : i32
    return %arg0, %c0_i32, %arg1 : i32, i32, i32
  }
}

</mosaic_0001>

<bundles_post_ra>
// kernel: tpu_custom_call.1
= control target key start
LH: loop header
LB: loop body
LE: loop exit
PB: predicated region body
PF: predicated region fallthrough
CT: control target
= control target key end

     0   :  { %s1338_s0 = inlined_call_operand.vmem [shape: f32[1,4,288], index: 0, kind: input, shape index: {}]   ;;  %s1339_s1 = inlined_call_operand.vmem [shape: f32[1,4,288], index: 1, kind: input, shape index: {}]   ;;  %s1340_s2 = inlined_call_operand.vmem [shape: f32[8,4], index: 2, kind: input, shape index: {}]   ;;  %s1341_s3 = inlined_call_operand.vmem [shape: f32[8,4], index: 3, kind: input, shape index: {}]   ;;  %s1342_s4 = inlined_call_operand.hbm [shape: f32[4,8], index: 4, kind: input, shape index: {}]   ;;  %s1343_s5 = inlined_call_operand.vmem [shape: f32[4,8], index: 5, kind: input, shape index: {}]   ;;  %s1344_s6 = inlined_call_operand.hbm [shape: f32[1,4,288], index: 6, kind: output, shape index: {0}]   ;;  %s1345_s7 = inlined_call_operand.hbm [shape: f32[1,4,288], index: 7, kind: output, shape index: {1}]  }
   0x1   :  { %1348 = sst [smem:[#allocation11_spill]] %s1338_s0 }
   0x2   :  { %1349 = sst [smem:[#allocation12_spill]] %s1339_s1 }
   0x3   :  { %1350 = sst [smem:[#allocation13_spill]] %s1340_s2 }
   0x4   :  { %1351 = sst [smem:[#allocation14_spill]] %s1341_s3 }
   0x5   :  { %1352 = sst [smem:[#allocation15_spill]] %s1342_s4 }
   0x6   :  { %13 = vsyncpa [#allocation3], 0 }
   0x7   :  { %14 = vsyncpa [#allocation4], 0 }
   0x8   :  { %16 = vsyncpa [#allocation4 + $0x1], 0 }
   0x9   :  { %17 = vsyncpa [#allocation7], 0 }
   0xa   :  { %19 = vsyncpa [#allocation7 + $0x1], 0  ;;  %s1152_s24 = smov 0   ;;  %s1154_s25 = smov 0  }
   0xb   :  { %s1156_s26 = smov 0   ;;  %s1158_s27 = smov 0  }
   0xc   :  { %s1160_s28 = smov 0   ;;  %s1162_s29 = smov 0  }
   0xd LB: > { %s829_s30 = sadd.s32 4294967295, %s1107_s29   ;;  %s830_s8 = sadd.s32 4294967294, %s1107_s29   ;;  %s1107_s29 = sphi %s1162_s29, %s25_s29   ;;  %s1103_s28 = sphi %s1160_s28, %s1370_s28   ;;  %s1099_s27 = sphi %s1158_s27, %s1369_s27   ;;  %s1095_s26 = sphi %s1156_s26, %s1368_s26   ;;  %s1091_s25 = sphi %s1154_s25, %s1367_s25   ;;  %s1087_s24 = sphi %s1152_s24, %s1366_s24  }
   0xe   : > { %s34_s9 = sadd.s32 1, %s1103_s28  ;;  %s186_s10 = sadd.s32 1, %s1095_s26 }
   0xf   : > { %p35_p0 = scmp.ge.s32.totalorder %s34_s9, 2  ;;  %p196_p1 = scmp.ne.s32.totalorder %s1095_s26, %s1091_s25 }
  0x10   : > { %p197_p2 = scmp.eq.s32.totalorder %s829_s30, 1  ;;  %p202_p3 = scmp.ne.s32.totalorder %s1091_s25, %s1087_s24 }
  0x11   : > { %s1372_s9 = smov (%p35_p0, %s34_s9), 0  ;;  %p203_p5 = scmp.eq.s32.totalorder %s830_s8, 1 }
  0x12   : > { %p1192_p4 = por %p197_p2, %p196_p1  ;;  %s182_s12 = ssub.s32 %s1103_s28, %s1372_s9 }
  0x13   : > { %p831_p6 = scmp.ge.s32.totalorder %s1107_s29, 1  ;;  %p184_p7 = scmp.eq.s32.totalorder %s182_s12, 0 }
  0x14   : > { %p1199_p8 = por %p203_p5, %p202_p3  ;;  %p238_p9 = scmp.lt.s32.totalorder %s1107_s29, 3 }
  0x15   : > { %s1205_s14 = scalar_select %p184_p7, %s1095_s26, %s186_s10  }
  0x16   : > { %p239_p10 = pnand %p831_p6, %p238_p9  ;;  %p889_p11 = scmp.eq.s32.totalorder %s829_s30, 0 }
  0x17   : > { %s1355_s4 = sld [smem:[#allocation15_spill]]  ;;  %s1109_s18 = smov [#allocation2]  }
  0x18   : > { %p878_p12 = pneg %p239_p10  ;;  %s258_s19 = sshll.u32 %s1109_s18, 4  ;;  %s259_s19 = int_to_ptr.vmem [resolvable:$true] %s258_s19 }
  0x1a   : > { %p879_p13 = pnand %p889_p11, %p878_p12  ;;  %316 = sbr.rel (%p239_p10) target bundleno = 398 (0x18e), region = 44 }
  0x1d   : > { %s256_s17 = sshll.u32 %s1355_s4, 4  ;;  %s257_s17 = int_to_ptr.hbm [resolvable:$true] %s256_s17 }
  0x1e   : > { %881 = dma.hbm_to_vmem [thread:$0]  (!%p879_p13), %s257_s17, 64, %s259_s19, [#allocation3]  }
  0x1f   : > { %1074 = dma.done.wait (%p889_p11), [#allocation3], 64  }
  0x20   : > { %1076 = vsyncadd (%p889_p11), [#allocation3], 4294967232  ;;  %s1211_s20 = sshll.u32 %s1099_s27, 1  ;;  %s1356_s1 = sld [smem:[#allocation12_spill]]  ;;  %vm433_vm0 = vcmask 1043456   ;;  %vm429_vm1 = vcmask 31744  }
  0x21   : > { %p382_p0 = scmp.lt.s32.totalorder %s1211_s20, 2  ;;  %s1357_s0 = sld [smem:[#allocation11_spill]]  ;;  %vm532_vm2 = vcmask 64512   ;;  %v582_v16 = vld [vmem:[%s1343_s5] sm:$0xf] }
  0x22   : > { %s1358_s3 = sld [smem:[#allocation14_spill]]  ;;  %v531_v17 = vld [vmem:[#allocation2] sm:$0xf]  ;;  %s1235_s23 = sand.u32 1, %s1091_s25  }
  0x23   : > { %s383_s21 = scalar_select %p382_p0, %s1211_s20, 2 }
  0x24   : > { %s1359_s2 = sld [smem:[#allocation13_spill]]  ;;  %s836_s30 = sshll.u32 %s1235_s23, 3 }
  0x25   : > { %s839_s22 = sshll.u32 %s383_s21, 2  ;;  %s1240_s10 = scalar_lea.vmem [#allocation6], %s836_s30 }
  0x26   : > { %s405_s8 = scalar_lea.vmem %s1356_s1, %s839_s22  ;;  %s1346_s12 = scalar_lea.sflag [#allocation4], %s1235_s23 }
  0x27   : > { %v424_v0 = vld [vmem:[%s405_s8] sm:$0xff]  ;;  %s387_s15 = scalar_lea.vmem %s1357_s0, %s839_s22  ;;  %s367_s8 = scalar_lea.vmem [#allocation5], %s836_s30 }
  0x28   : > { %426 = vst [vmem:[#allocation1] ss:$2 sm:$0xff] %v424_v0  ;;  %v422_v1 = vld [vmem:[%s387_s15] sm:$0xff]  ;;  %s646_s16 = ssub.s32 (%p1192_p4), 3, %s1211_s20 }
  0x29   : > { %v423_v2 = vld [vmem:[%s1358_s3] sm:$0xff]  ;;  %p647_p1 = scmp.lt.s32.totalorder (%p1192_p4), %s646_s16, 2 }
  0x2a   : > { %v421_v5 = vld [vmem:[%s1359_s2] sm:$0xff] }
  0x2f   : > { %v427_v3 = vld.sshfl [vmem:[#allocation1] sm:$0xff pattern:$0x75316420]  ;;  %v428_v4 = vld.sshfl [vmem:[#allocation1 + $0x8] sm:$0xff pattern:$0x75316420] }
  0x30   : > { %479 = vst [vmem:[#allocation1] ss:$2 sm:$0xff] %v422_v1  ;;  %844 = vmatpush.msk.msra.mxu1 %vm433_vm0, %v428_v4  ;;  %842 = vmatpush.msk.msra.mxu0 %vm433_vm0, %v427_v3 }
  0x31   : > { %845 = vmatmul.msk.f32.vlgmr.msra.gmra.mxu1 %vm429_vm1, %v423_v2  ;;  %843 = vmatmul.msk.f32.vlgmr.msra.gmra.mxu0 %vm429_vm1, %v423_v2 }
  0x37   : > { %v481_v6 = vld.sshfl [vmem:[#allocation1 + $0x8] sm:$0xff pattern:$0x75316420]  ;;  %v480_v7 = vld.sshfl [vmem:[#allocation1] sm:$0xff pattern:$0x75316420] }
  0x38   : > { %848 = vmatpush.msk.msra.mxu3 %vm433_vm0, %v481_v6  ;;  %846 = vmatpush.msk.msra.mxu2 %vm433_vm0, %v480_v7 }
  0x39   : > { %849 = vmatmul.msk.f32.vlgmr.msra.gmra.mxu3 %vm429_vm1, %v421_v5  ;;  %847 = vmatmul.msk.f32.vlgmr.msra.gmra.mxu2 %vm429_vm1, %v421_v5 }
  0xae   : > { %v475_v8 = vpop.f32.mrf.mxu1  ;;  %v455_v9 = vpop.f32.mrf.mxu0 }
  0xbc   : > { %v526_v10 = vpop.f32.mrf.mxu3  ;;  %v506_v11 = vpop.f32.mrf.mxu2 }
  0xbd   : > { %v527_v12 = vadd.f32 %v526_v10, %v475_v8  ;;  %v507_v13 = vadd.f32 %v506_v11, %v455_v9 }
  0xbf   : > { %v530_v14 = vmax.f32 %v527_v12, 0.0  ;;  %v529_v15 = vmax.f32 %v507_v13, 0.0 }
  0xc1   : > { %571 = vmatpush.msrb.mxu1 %v530_v14  ;;  %621 = vmatpush.msrb.mxu3 %v530_v14 }
  0xc2   : > { %551 = vmatpush.msrb.mxu0 %v529_v15  ;;  %601 = vmatpush.msrb.mxu2 %v529_v15 }
  0xc3   : > { %853 = vmatmul.msk.f32.vlgmr.msrb.gmra.mxu3 %vm532_vm2, %v582_v16  ;;  %852 = vmatmul.msk.f32.vlgmr.msrb.gmra.mxu2 %vm532_vm2, %v582_v16 }
  0xc4   : > { %851 = vmatmul.msk.f32.vlgmr.msrb.gmra.mxu1 %vm532_vm2, %v531_v17  ;;  %850 = vmatmul.msk.f32.vlgmr.msrb.gmra.mxu0 %vm532_vm2, %v531_v17 }
 0x141   : > { %v573_v18 = vpop.f32.mrf.mxu1  ;;  %v553_v19 = vpop.f32.mrf.mxu0 }
 0x142   : > { %v578_v20 = vrot.slane %v573_v18, 4 }
 0x144   : > { %v579_v21 = vsel %vm433_vm0, %v553_v19, %v578_v20 }
 0x145   : > { %581 = vst [vmem:[%s367_s8] sm:$0xff] %v579_v21 }
 0x146   : > { %v623_v22 = vpop.f32.mrf.mxu3  ;;  %v603_v23 = vpop.f32.mrf.mxu2  ;;  %644 = sbr.rel (!%p1192_p4) target bundleno = 362 (0x16a), region = 52 }
 0x147   : > { %v628_v24 = vrot.slane %v623_v22, 4 }
 0x149   : > { %v629_v25 = vsel %vm433_vm0, %v603_v23, %v628_v24 }
 0x14a   : > { %631 = vst [vmem:[%s1240_s10] sm:$0xff] %v629_v25 }
 0x14b   : > { %s1374_s16 = smov (!%p647_p1, %s646_s16), 2 }
 0x14c   : > { %s857_s17 = sshll.u32 %s1374_s16, 2 }
 0x14d   : > { %s650_s18 = ssub.s32 8, %s857_s17 }
 0x14e   : > { %s651_s19 = sshll.u32 %s650_s18, 4 }
 0x14f   : > { %652 = vsyncadd %s1346_s12, %s651_s19  ;;  %p1253_p2 = scmp.ne.s32.totalorder %s857_s17, 0  ;;  %s870_s22 = sshll.u32 %s1099_s27, 3 }
 0x150   : > { %s657_s0 = scalar_lea.hbm %s1344_s6, %s870_s22  ;;  %s1347_s1 = sshll.u32 %s1374_s16, 6 }
 0x151   : > { %s660_s2 = sshll.u32 %s367_s8, 4  ;;  %s662_s3 = sshll.u32 %s657_s0, 4  ;;  %s661_s2 = int_to_ptr.vmem [resolvable:$true] %s660_s2  ;;  %s663_s3 = int_to_ptr.hbm [resolvable:$true] %s662_s3 }
 0x152   : > { %s971_s18 = sshra.s32 %s661_s2, 4  ;;  %s973_s19 = sshrl.u32 %s1347_s1, 4  ;;  %s972_s18 = int_to_ptr.vmem [resolvable:$true] %s971_s18 }
 0x153   : > { %s978_s12 = scalar_lea.vmem %s972_s18, %s973_s19  ;;  %s1110_s17 = smov [#allocation5]  }
 0x154   : > { %p979_p3 = scmp.ne.s32.totalorder %s972_s18, %s978_s12  ;;  %s982_s4 = scalar_lea.vmem %s1110_s17, 16 }
 0x155   : > { %p984_p7 = scmp.lt.s32.totalorder %s982_s4, %s978_s12 }
 0x156   : > { %p980_p5 = pnand %p979_p3, %p1253_p2 }
 0x158   : > { %p981_p6 = pneg %p980_p5 }
 0x15a   : > { %p986_p9 = pnand %p984_p7, %p981_p6 }
 0x15c   : > { %989 = shalt.err (!%p986_p9)
}
 0x15d   : > { %s990_s15 = sshra.s32 %s663_s3, 4  ;;  %s1001_s30 = scalar_lea.hbm %s1344_s6, 12  ;;  %s991_s15 = int_to_ptr.hbm [resolvable:$true] %s990_s15 }
 0x15e   : > { %s997_s0 = scalar_lea.hbm %s991_s15, %s973_s19  ;;  %p1002_p13 = scmp.lt.s32.totalorder %s991_s15, %s1344_s6 }
 0x15f   : > { %p998_p10 = scmp.ne.s32.totalorder %s991_s15, %s997_s0  ;;  %p1003_p0 = scmp.lt.s32.totalorder %s1001_s30, %s997_s0 }
 0x161   : > { %p999_p11 = pnand %p998_p10, %p1253_p2  ;;  %p1004_p1 = por %p1003_p0, %p1002_p13 }
 0x163   : > { %p1000_p12 = pneg %p999_p11 }
 0x165   : > { %p1005_p3 = pnand %p1004_p1, %p1000_p12 }
 0x167   : > { %1008 = shalt.err (!%p1005_p3)
}
 0x168   : > { %s1361_s4 = scalar_lea.sflag [#allocation4], %s1235_s23  ;;  %s1362_s12 = sshll.u32 %s1374_s16, 6 }
 0x169   : > { %665 = dma.vmem_to_hbm [thread:$0]  (%p1253_p2), %s661_s2, %s1362_s12, %s663_s3, %s1361_s4  }
 0x16a PF: > { %668 = sbr.rel (!%p1192_p4) target bundleno = 398 (0x18e), region = 56  ;;  %s670_s19 = ssub.s32 (%p1192_p4), 3, %s1211_s20 }
 0x16b   : > { %p671_p5 = scmp.lt.s32.totalorder (%p1192_p4), %s670_s19, 2  ;;  %s1363_s21 = scalar_lea.sflag (%p1192_p4), [#allocation7], %s1235_s23 }
 0x16f   : > { %s1376_s19 = smov (!%p671_p5, %s670_s19), 2 }
 0x170   : > { %s863_s1 = sshll.u32 %s1376_s19, 2 }
 0x171   : > { %s674_s17 = ssub.s32 8, %s863_s1 }
 0x172   : > { %s675_s15 = sshll.u32 %s674_s17, 4 }
 0x173   : > { %676 = vsyncadd %s1363_s21, %s675_s15  ;;  %p1288_p2 = scmp.ne.s32.totalorder %s863_s1, 0  ;;  %s871_s3 = sshll.u32 %s1099_s27, 3 }
 0x174   : > { %s681_s16 = scalar_lea.hbm %s1345_s7, %s871_s3  ;;  %s867_s0 = sshll.u32 %s1376_s19, 6 }
 0x175   : > { %s684_s8 = sshll.u32 %s1240_s10, 4  ;;  %s686_s22 = sshll.u32 %s681_s16, 4  ;;  %s685_s8 = int_to_ptr.vmem [resolvable:$true] %s684_s8  ;;  %s687_s22 = int_to_ptr.hbm [resolvable:$true] %s686_s22 }
 0x176   : > { %s1010_s30 = sshra.s32 %s685_s8, 4  ;;  %s1012_s18 = sshrl.u32 %s867_s0, 4  ;;  %s1011_s30 = int_to_ptr.vmem [resolvable:$true] %s1010_s30 }
 0x177   : > { %s1017_s4 = scalar_lea.vmem %s1011_s30, %s1012_s18  ;;  %s1111_s12 = smov [#allocation6]  }
 0x178   : > { %p1018_p4 = scmp.ne.s32.totalorder %s1011_s30, %s1017_s4  ;;  %s1021_s27 = scalar_lea.vmem %s1111_s12, 16 }
 0x179   : > { %p1023_p9 = scmp.lt.s32.totalorder %s1021_s27, %s1017_s4 }
 0x17a   : > { %p1019_p6 = pnand %p1018_p4, %p1288_p2 }
 0x17c   : > { %p1020_p7 = pneg %p1019_p6 }
 0x17e   : > { %p1025_p10 = pnand %p1023_p9, %p1020_p7 }
 0x180   : > { %1028 = shalt.err (!%p1025_p10)
}
 0x181   : > { %s1029_s1 = sshra.s32 %s687_s22, 4  ;;  %s1040_s21 = scalar_lea.hbm %s1345_s7, 12  ;;  %s1030_s1 = int_to_ptr.hbm [resolvable:$true] %s1029_s1 }
 0x182   : > { %s1036_s10 = scalar_lea.hbm %s1030_s1, %s1012_s18  ;;  %p1041_p0 = scmp.lt.s32.totalorder %s1030_s1, %s1345_s7 }
 0x183   : > { %p1037_p11 = scmp.ne.s32.totalorder %s1030_s1, %s1036_s10  ;;  %p1042_p1 = scmp.lt.s32.totalorder %s1040_s21, %s1036_s10 }
 0x185   : > { %p1038_p12 = pnand %p1037_p11, %p1288_p2  ;;  %p1043_p3 = por %p1042_p1, %p1041_p0 }
 0x187   : > { %p1039_p13 = pneg %p1038_p12 }
 0x189   : > { %p1044_p5 = pnand %p1043_p3, %p1039_p13 }
 0x18b   : > { %1047 = shalt.err (!%p1044_p5)
}
 0x18c   : > { %s1365_s20 = scalar_lea.sflag [#allocation7], %s1235_s23 }
 0x18d   : > { %689 = dma.vmem_to_hbm [thread:$0]  (%p1288_p2), %s685_s8, %s867_s0, %s687_s22, %s1365_s20  }
 0x18e PF: > { %p891_p4 = scmp.ge.s32.totalorder %s1107_s29, 2  ;;  %s698_s16 = sand.u32 1, %s1087_s24  }
 0x18f   : > { %s699_s30 = scalar_lea.sflag [#allocation4], %s698_s16 }
 0x190   : > { %p883_p6 = pnand %p891_p4, %p1199_p8 }
 0x192   : > { %p884_p7 = pneg %p883_p6 }
 0x194   : > { %1078 = dma.done.wait (%p884_p7), %s699_s30, 128  }
 0x195   : > { %1080 = vsyncadd (%p884_p7), %s699_s30, 4294967168  ;;  %s709_s18 = scalar_lea.sflag [#allocation7], %s698_s16 }
 0x196   : > { %1082 = dma.done.wait (%p884_p7), %s709_s18, 128  }
 0x197   : > { %1084 = vsyncadd (%p884_p7), %s709_s18, 4294967168  ;;  %s25_s29 = sadd.s32 1, %s1107_s29   ;;  %s1366_s24 = smov %s1091_s25 }
 0x198   : > { %p22_p9 = scmp.ge.s32.totalorder %s25_s29, 4   ;;  %s1367_s25 = smov %s1095_s26 }
 0x199   : > { %s1368_s26 = smov %s1205_s14  ;;  %s1369_s27 = smov %s1103_s28 }
 0x19a   : > { %s1370_s28 = smov %s1372_s9  ;;  %24 = sbr.rel (!%p22_p9) target bundleno = 13 (0xd), region = 104 }
 0x19f   :  { %715 = vsyncpa [#allocation3], 1 }
 0x1a0   :  { %717 = vsyncpa [#allocation3 + $0x1], 1 }
 0x1a1   :  { %718 = vsyncpa [#allocation4], 1 }
 0x1a2   :  { %720 = vsyncpa [#allocation4 + $0x1], 1 }
 0x1a3   :  { %721 = vsyncpa [#allocation7], 1 }
 0x1a4   :  { %723 = vsyncpa [#allocation7 + $0x1], 1 }

</bundles_post_ra>
